<compile_context>
chip_gen: v5e
topology: v5e:2x2
jax: 0.10.0
libtpu: 0.0.40
codegen_flags: <defaults>
</compile_context>

<pallas_src>
import functools

import jax
import jax.numpy as jnp
from jax.experimental import pallas as pl
from jax.experimental.pallas import tpu as pltpu


def _round_up(x, m):
    return (x + m - 1) // m * m


def _round_down(x, m):
    return x // m * m


def _make_outconv_kernel(nb):
    """Kernel for a (nb, Cin, tn) input block and (nb, Cout, tn) output block."""

    def kernel(x_ref, w_ref, b_ref, o_ref):
        # x_ref: (nb, Cin, tn)   pixel tiles of nb batch elements
        # w_ref: (Cout, Cin)     full 1x1-conv weight (resident)
        # b_ref: (Cout, 1)       bias column (broadcasts over lanes)
        # o_ref: (nb, Cout, tn)  output tiles
        w = w_ref[...]
        b = b_ref[...]
        for i in range(nb):  # static unroll over batch elements in the block
            acc = jnp.dot(w, x_ref[i], preferred_element_type=jnp.float32)
            o_ref[i] = (acc + b).astype(o_ref.dtype)

    return kernel


def _pick_tiles(n, hw, cin, cout, itemsize, bytes_per_step, vmem_buffer_budget):
    """Pick (Nb, tn) so each grid step moves ~bytes_per_step of HBM traffic.

    The bytes-per-step target hides the ~0.35 us per-step pipeline overhead
    even at v7x's 3.2 TB/s HBM; the VMEM cap keeps the double-buffered
    x+out blocks inside a conservative budget on all generations.
    """
    per_col = (cin + cout) * itemsize                  # HBM bytes per pixel column
    vmem_cap_cols = max(128, vmem_buffer_budget // (per_col * 2))  # 2 = double buf
    goal_cols = max(128, min(bytes_per_step // per_col, vmem_cap_cols))

    if hw >= goal_cols:
        # Pixel axis alone is big enough: one batch element per step.
        tn = _round_down(goal_cols, 128)               # multiple of 128 (legal block)
        nb = 1
    else:
        # Small image: take the full pixel axis and block multiple batch
        # elements per step.
        tn = hw                                        # full dim -> always legal
        nb = max(1, min(n, goal_cols // max(hw, 1)))
        while n % nb:                                  # avoid ragged batch blocks
            nb -= 1

    # Guarantee >= 2 blocks on the parallel grid when possible (v7x: 2 TCs).
    if (n // nb) * pl.cdiv(hw, tn) < 2:
        if n > 1:
            nb = max(1, nb // 2)
            while n % nb:
                nb -= 1
        elif hw > 128:
            tn = min(tn, _round_up(pl.cdiv(hw, 2), 128))

    return nb, tn


@functools.partial(
    jax.jit, static_argnames=("bytes_per_step", "vmem_buffer_budget"))
def outconv_forward(x_nchw, weight, bias, *,
                    bytes_per_step=2 * 1024 * 1024,
                    vmem_buffer_budget=24 * 1024 * 1024):
    """1x1 Conv2d forward (matches nn.Conv2d(in, out, kernel_size=1)).

    Args:
      x_nchw: (N, Cin, H, W) input (PyTorch layout).
      weight: (Cout, Cin, 1, 1) conv weight.
      bias:   (Cout,) conv bias.
      bytes_per_step: target HBM traffic per grid step (hides step overhead).
      vmem_buffer_budget: cap for double-buffered x+out blocks in VMEM.
    Returns:
      (N, Cout, H, W) output, same dtype as input.
    """
    N, Cin, H, W = x_nchw.shape
    Cout = weight.shape[0]
    HW = H * W

    x3 = x_nchw.reshape(N, Cin, HW)        # view-only, no HBM transpose pass
    w2 = weight.reshape(Cout, Cin)
    b2 = bias.reshape(Cout, 1)

    nb, tn = _pick_tiles(N, HW, Cin, Cout, x_nchw.dtype.itemsize,
                         bytes_per_step, vmem_buffer_budget)
    grid = (N // nb, pl.cdiv(HW, tn))

    cost = pl.CostEstimate(
        flops=2 * N * HW * Cin * Cout,
        transcendentals=0,
        bytes_accessed=(N * HW * (Cin + Cout) + Cout * Cin + Cout)
        * x_nchw.dtype.itemsize,
    )

    out3 = pl.pallas_call(
        _make_outconv_kernel(nb),
        out_shape=jax.ShapeDtypeStruct((N, Cout, HW), x_nchw.dtype),
        grid_spec=pltpu.PrefetchScalarGridSpec(
            num_scalar_prefetch=0,
            grid=grid,
            in_specs=[
                pl.BlockSpec((nb, Cin, tn), lambda n, j: (n, 0, j)),   # x tile
                pl.BlockSpec((Cout, Cin), lambda n, j: (0, 0)),        # weight
                pl.BlockSpec((Cout, 1), lambda n, j: (0, 0)),          # bias col
            ],
            out_specs=pl.BlockSpec((nb, Cout, tn), lambda n, j: (n, 0, j)),
        ),
        compiler_params=pltpu.CompilerParams(
            dimension_semantics=("parallel", "parallel"),
            vmem_limit_bytes=48 * 1024 * 1024,
        ),
        cost_estimate=cost,
    )(x3, w2, b2)

    # (N, Cout, H*W) -> (N, Cout, H, W): free reshape, no transpose needed.
    return out3.reshape(N, Cout, H, W)


def _reference(x, weight, bias):
    Cout, Cin = weight.shape[0], weight.shape[1]
    return (jnp.einsum("nchw,oc->nohw", x, weight.reshape(Cout, Cin))
            + bias[None, :, None, None])


if __name__ == "__main__":
    key = jax.random.PRNGKey(0)
    kx, kw, kb, kx2 = jax.random.split(key, 4)

    N, Cin, Cout, S = 2, 4, 3, 16

    x = jax.random.normal(kx, (N, Cin, S, S), dtype=jnp.float32)

    # Deterministic init matching nn.Conv2d defaults:
    # uniform(-1/sqrt(fan_in), 1/sqrt(fan_in)) with fan_in = Cin * 1 * 1.
    bound = 1.0 / (Cin ** 0.5)
    weight = jax.random.uniform(
        kw, (Cout, Cin, 1, 1), dtype=jnp.float32, minval=-bound, maxval=bound)
    bias = jax.random.uniform(
        kb, (Cout,), dtype=jnp.float32, minval=-bound, maxval=bound)

    # Test 1: small batched image (multi-batch blocking / >=2 grid blocks path).
    y = outconv_forward(x, weight, bias)
    jax.block_until_ready(y)
    y_ref = _reference(x, weight, bias)
    assert y.shape == (N, Cout, S, S)
    assert jnp.allclose(y, y_ref, atol=1e-5, rtol=1e-5)

    # Test 2: single image with a pixel count that is not a multiple of the
    # tile width (exercises the ragged boundary-block writeback).
    x2 = jax.random.normal(kx2, (1, Cin, 24, 24), dtype=jnp.float32)
    y2 = outconv_forward(x2, weight, bias)
    jax.block_until_ready(y2)
    y2_ref = _reference(x2, weight, bias)
    assert y2.shape == (1, Cout, 24, 24)
    assert jnp.allclose(y2, y2_ref, atol=1e-5, rtol=1e-5)

    print("KERNEL_OK")
</pallas_src>

<mosaic_0001>
module attributes {stable_mosaic.version = 11 : i64} {
  func.func @kernel(%arg0: i32, %arg1: i32, %arg2: memref<1x4x256xf32, #tpu.memory_space<vmem>>, %arg3: memref<3x4xf32, #tpu.memory_space<vmem>>, %arg4: memref<3x1xf32, #tpu.memory_space<vmem>>, %arg5: memref<1x3x256xf32, #tpu.memory_space<vmem>>) attributes {dimension_semantics = [#tpu.dimension_semantics<parallel>, #tpu.dimension_semantics<parallel>], iteration_bounds = array<i64: 2, 1>, scalar_prefetch = 0 : i64, scratch_operands = 0 : i64, tpu.core_type = #tpu.core_type<tc>, window_params = [{transform_indices = @transform_0, window_bounds = array<i64: 1, 4, 256>}, {pipeline_mode = #tpu.pipeline_mode<synchronous>, transform_indices = @transform_1, window_bounds = array<i64: 3, 4>}, {pipeline_mode = #tpu.pipeline_mode<synchronous>, transform_indices = @transform_2, window_bounds = array<i64: 3, 1>}, {transform_indices = @transform_3, window_bounds = array<i64: 1, 3, 256>}]} {
    %c0 = arith.constant 0 : index
    %c0_0 = arith.constant 0 : index
    %0 = vector.load %arg3[%c0, %c0_0] : memref<3x4xf32, #tpu.memory_space<vmem>>, vector<3x4xf32>
    %c0_1 = arith.constant 0 : index
    %c0_2 = arith.constant 0 : index
    %1 = vector.load %arg4[%c0_1, %c0_2] : memref<3x1xf32, #tpu.memory_space<vmem>>, vector<3x1xf32>
    %c0_3 = arith.constant 0 : index
    %c0_4 = arith.constant 0 : index
    %c0_5 = arith.constant 0 : index
    %2 = vector.load %arg2[%c0_3, %c0_4, %c0_5] : memref<1x4x256xf32, #tpu.memory_space<vmem>>, vector<1x4x256xf32>
    %3 = vector.shape_cast %2 : vector<1x4x256xf32> to vector<4x256xf32>
    %cst = arith.constant dense<0.000000e+00> : vector<3x256xf32>
    %4 = tpu.matmul %0, %3, %cst {dimension_numbers = #tpu.dot_dimension_numbers<[1], [0], [0], [1], [0, 0, 1, 1], [], []>} : vector<3x4xf32>, vector<4x256xf32>, vector<3x256xf32> -> vector<3x256xf32>
    %5 = vector.broadcast %1 : vector<3x1xf32> to vector<3x256xf32>
    %6 = arith.addf %4, %5 : vector<3x256xf32>
    %c0_6 = arith.constant 0 : index
    %c0_7 = arith.constant 0 : index
    %c0_8 = arith.constant 0 : index
    %7 = vector.load %arg5[%c0_6, %c0_7, %c0_8] : memref<1x3x256xf32, #tpu.memory_space<vmem>>, vector<1x3x256xf32>
    %8 = vector.shape_cast %7 : vector<1x3x256xf32> to vector<3x256xf32>
    %9 = vector.shape_cast %6 : vector<3x256xf32> to vector<1x3x256xf32>
    tpu.vector_store %arg5[%c0_6, %c0_7, %c0_8], %9 {strides = array<i32>} : memref<1x3x256xf32, #tpu.memory_space<vmem>>, vector<1x3x256xf32>,
    return
  }
  func.func @transform_0(%arg0: i32, %arg1: i32) -> (i32, i32, i32) {
    %c0_i32 = arith.constant 0 : i32
    %c0_i32_0 = arith.constant 0 : i32
    return %arg0, %c0_i32, %arg1 : i32, i32, i32
  }
  func.func @transform_1(%arg0: i32, %arg1: i32) -> (i32, i32) {
    %c0_i32 = arith.constant 0 : i32
    %c0_i32_0 = arith.constant 0 : i32
    %c0_i32_1 = arith.constant 0 : i32
    return %c0_i32, %c0_i32_0 : i32, i32
  }
  func.func @transform_2(%arg0: i32, %arg1: i32) -> (i32, i32) {
    %c0_i32 = arith.constant 0 : i32
    %c0_i32_0 = arith.constant 0 : i32
    %c0_i32_1 = arith.constant 0 : i32
    return %c0_i32, %c0_i32_0 : i32, i32
  }
  func.func @transform_3(%arg0: i32, %arg1: i32) -> (i32, i32, i32) {
    %c0_i32 = arith.constant 0 : i32
    %c0_i32_0 = arith.constant 0 : i32
    return %arg0, %c0_i32, %arg1 : i32, i32, i32
  }
}

</mosaic_0001>

<bundles_post_ra>
// kernel: outconv_forward.1
= control target key start
LH: loop header
LB: loop body
LE: loop exit
PB: predicated region body
PF: predicated region fallthrough
CT: control target
= control target key end

     0   :  { %s452_s12 = smov 0   ;;  %s454_s13 = smov 0   ;;  %s494_s0 = inlined_call_operand.vmem [shape: f32[2,4,256], index: 0, kind: input, shape index: {}]   ;;  %s495_s1 = inlined_call_operand.vmem [shape: f32[3,4], index: 1, kind: input, shape index: {}]   ;;  %s496_s2 = inlined_call_operand.vmem [shape: f32[3,1], index: 2, kind: input, shape index: {}]   ;;  %s497_s3 = inlined_call_operand.vmem [shape: f32[2,3,256], index: 3, kind: output, shape index: {}]  }
   0x1   :  { %s456_s14 = smov 0  }
   0x2 LB: > { %s25_s15 = sadd.s32 1, %s425_s13  ;;  %p368_p0 = scmp.ge.s32.totalorder %s429_s14, 1  ;;  %s429_s14 = sphi %s456_s14, %s13_s14   ;;  %s425_s13 = sphi %s454_s13, %s499_s13   ;;  %s421_s12 = sphi %s452_s12, %s498_s12  }
   0x3   : > { %p27_p1 = scmp.ge.s32.totalorder %s25_s15, 2  ;;  %p158_p2 = scmp.lt.s32.totalorder %s429_s14, 3 }
   0x5   : > { %s501_s15 = smov (%p27_p1, %s25_s15), 0  ;;  %p159_p3 = pnand %p368_p0, %p158_p2 }
   0x6   : > { %p191_p4 = scmp.lt.s32.totalorder (!%p159_p3), %s421_s12, 1 }
   0x7   : > { %162 = sbr.rel (%p159_p3) target bundleno = 157 (0x9d), region = 32 }
   0xc   : > { %v431_v0 = vmov 0   ;;  %v211_v1 = vld [vmem:[%s496_s2] sm:$0x7]  ;;  %s503_s12 = smov (!%p191_p4, %s421_s12), 1  ;;  %vm226_vm0 = vcmask 1043456   ;;  %vm222_vm1 = vcmask 31744  }
   0xd   : > { %406 = vset.pattern.permute.xlu0 %v431_v0  ;;  %s379_s18 = sshll.u32 %s503_s12, 3  ;;  %v210_v3 = vld [vmem:[%s495_s1] sm:$0x7] }
   0xe   : > { %215 = vperm.xlu0 %406, %v211_v1   ;;  %s198_s21 = scalar_lea.vmem %s494_s0, %s379_s18  ;;  %s208_s26 = scalar_lea.vmem %s497_s3, %s379_s18 }
   0xf   : > { %v212_v2 = vld [vmem:[%s198_s21] sm:$0xff] }
  0x10   : > { %219 = vst [vmem:[#allocation1] ss:$2 sm:$0xff] %v212_v2 }
  0x17   : > { %v220_v4 = vld.sshfl [vmem:[#allocation1] sm:$0xff pattern:$0x75316420]  ;;  %v221_v5 = vld.sshfl [vmem:[#allocation1 + $0x8] sm:$0xff pattern:$0x75316420] }
  0x18   : > { %373 = vmatpush.msk.msra.mxu0 %vm226_vm0, %v220_v4  ;;  %375 = vmatpush.msk.msra.mxu1 %vm226_vm0, %v221_v5 }
  0x19   : > { %374 = vmatmul.msk.f32.vlgmr.msra.gmra.mxu0 %vm222_vm1, %v210_v3  ;;  %376 = vmatmul.msk.f32.vlgmr.msra.gmra.mxu1 %vm222_vm1, %v210_v3 }
  0x80   : > { %v216_v6 = vpop.permute.xlu0 %215 }
  0x96   : > { %v248_v7 = vpop.f32.mrf.mxu0  ;;  %v268_v8 = vpop.f32.mrf.mxu1 }
  0x97   : > { %v269_v9 = vadd.f32 %v268_v8, %v216_v6  ;;  %v249_v10 = vadd.f32 %v248_v7, %v216_v6 }
  0x99   : > { %v273_v11 = vrot.slane %v269_v9, 4 }
  0x9b   : > { %v274_v12 = vsel %vm226_vm0, %v249_v10, %v273_v11 }
  0x9c   : > { %276 = vst [vmem:[%s208_s26] sm:$0x77] %v274_v12 }
  0x9d PF: > { %s13_s14 = sadd.s32 1, %s429_s14   ;;  %s498_s12 = smov %s425_s13 }
  0x9e   : > { %p10_p5 = scmp.ge.s32.totalorder %s13_s14, 4   ;;  %s499_s13 = smov %s501_s15 }
  0xa0   :  { %12 = sbr.rel (!%p10_p5) target bundleno = 2 (0x2), region = 62 }

</bundles_post_ra>
